<compile_context>
chip_gen: v5e
topology: v5e:2x2
jax: 0.10.0
libtpu: 0.0.40
codegen_flags: <defaults>
</compile_context>

<pallas_src>
import functools

import jax
import jax.numpy as jnp
from jax.experimental import pallas as pl
from jax.experimental.pallas import tpu as pltpu


# ----------------------------------------------------------------------------
# In-kernel math helpers (`power` is a static Python value).
# ----------------------------------------------------------------------------

def _pow_elementwise(xf, power):
    """x**power in f32. Integer powers -> repeated VALU multiplies."""
    if power == 2:
        return xf * xf
    if isinstance(power, int) and power >= 1:
        xp = xf
        for _ in range(power - 1):           # static unroll; small p
            xp = xp * xf
        return xp
    # Fractional power: EUP exp/log (NaN for negative inputs, like x.pow()).
    return jnp.exp(jnp.log(xf) * float(power))


def _inv_root(s, power):
    """s**(-1/power): reciprocal norm (root + reciprocal folded into one op)."""
    if power == 2:
        return jax.lax.rsqrt(s)              # single EUP op, free slot
    return jnp.exp(jnp.log(s) * (-1.0 / float(power)))


# ----------------------------------------------------------------------------
# Kernels.
# ----------------------------------------------------------------------------

def _make_rowwise_kernel(power):
    """General path: block (tile_n, D); reduce over the feature (lane) axis."""
    def kernel(x_ref, o_ref):
        xf = x_ref[...].astype(jnp.float32)                  # accumulate in f32
        s = jnp.sum(_pow_elementwise(xf, power), axis=1, keepdims=True)
        o_ref[...] = (xf * _inv_root(s, power)).astype(o_ref.dtype)
    return kernel


def _make_lane_dense_kernel(power):
    """Lane-dense path (D < 128, 128 % D == 0): x was reshaped to (M, 128).

    Each 128-lane row holds G = 128 // D original rows.  Per-row sums become a
    segmented reduction computed on the MXU as xp @ B, where B is a constant
    block-diagonal 0/1 matrix: the result holds each segment's sum broadcast
    across that segment's lanes.  The f32 summands are split into exact bf16
    hi + lo parts so two full-rate bf16 MXU passes reproduce the f32 sum.
    """
    def kernel(x_ref, b_ref, o_ref):
        xf = x_ref[...].astype(jnp.float32)                  # (tr, 128)
        xp = _pow_elementwise(xf, power)
        hi = xp.astype(jnp.bfloat16)
        lo = (xp - hi.astype(jnp.float32)).astype(jnp.bfloat16)
        b = b_ref[...]                                       # (128, 128) bf16 0/1
        s = (jnp.dot(hi, b, preferred_element_type=jnp.float32)
             + jnp.dot(lo, b, preferred_element_type=jnp.float32))
        o_ref[...] = (xf * _inv_root(s, power)).astype(o_ref.dtype)
    return kernel


# ----------------------------------------------------------------------------
# Tiling / wrapper.
# ----------------------------------------------------------------------------

_TARGET_TILE_BYTES = 2 * 1024 * 1024   # ~85% of HBM roofline per measured data
_MIN_GRID_STEPS = 8                    # give both v7x TensorCores work + pipeline depth


def _pick_tile_rows(num_rows, row_bytes, itemsize, override=None):
    """Rows per tile, sized in bytes (no fixed row cap)."""
    sublane = 8 * max(1, 4 // itemsize)            # 8 f32, 16 bf16, 32 int8
    if override is not None:
        tr = max(1, min(int(override), num_rows))
        if tr < num_rows:                          # partial grids need 8-aligned blocks
            tr = max(sublane, (tr // sublane) * sublane)
        return min(tr, num_rows)
    if num_rows <= sublane:
        return num_rows                            # full-extent block: always legal
    tr = max(sublane, _TARGET_TILE_BYTES // max(1, row_bytes))
    # Prefer >= _MIN_GRID_STEPS steps: shards the "parallel" axis across
    # TensorCores (v7x) and keeps the double-buffered DMA pipeline busy.
    tr = min(tr, max(sublane, num_rows // _MIN_GRID_STEPS))
    tr = max(sublane, (tr // sublane) * sublane)
    return min(tr, num_rows)


def _vmem_limit_bytes(tile_bytes):
    # 2x double-buffered (in + out) tiles + compiler scratch for the full-tile
    # f32 intermediates; capped well below v7x's 64 MiB/TC physical VMEM.
    return int(min(56 * 1024 * 1024,
                   max(32 * 1024 * 1024, 12 * tile_bytes + (4 << 20))))


@functools.partial(jax.jit, static_argnames=("power", "tile_rows"))
def normalize(x: jax.Array, power=2, tile_rows=None) -> jax.Array:
    """Pallas TPU implementation of Normalize.forward for 2-D (N, D) input."""
    if x.ndim != 2:
        # TODO(synk): >2-D inputs (channel-dim normalization of NCHW) need a
        # strided-reduction layout; only the 2-D projection-head case is done.
        raise NotImplementedError("normalize: only 2-D (N, D) inputs supported")
    if float(power) == int(power):
        power = int(power)

    N, D = x.shape
    itemsize = jnp.dtype(x.dtype).itemsize

    lane_dense = (0 < D < 128) and (128 % D == 0) and ((N * D) % 128 == 0)
    if lane_dense:
        # Lane-dense repack: (N, D) -> (M, 128), G = 128 // D rows per 128 lanes.
        M = (N * D) // 128
        xr = x.reshape(M, 128)              # free: contiguous row-major reshape
        lane = jnp.arange(128, dtype=jnp.int32)
        bmat = (lane[:, None] // D == lane[None, :] // D).astype(jnp.bfloat16)

        tr = _pick_tile_rows(M, 128 * itemsize, itemsize, tile_rows)
        tile_bytes = tr * 128 * itemsize
        cost = pl.CostEstimate(
            flops=int(4 * M * 128 * 128 + 6 * N * D),
            transcendentals=int(N * D),
            bytes_accessed=int(2 * N * D * itemsize + 128 * 128 * 2))
        out = pl.pallas_call(
            _make_lane_dense_kernel(power),
            out_shape=jax.ShapeDtypeStruct((M, 128), x.dtype),
            grid=(pl.cdiv(M, tr),),
            in_specs=[pl.BlockSpec((tr, 128), lambda i: (i, 0)),
                      pl.BlockSpec((128, 128), lambda i: (0, 0))],
            out_specs=pl.BlockSpec((tr, 128), lambda i: (i, 0)),
            compiler_params=pltpu.CompilerParams(
                dimension_semantics=("parallel",),
                vmem_limit_bytes=_vmem_limit_bytes(tile_bytes)),
            cost_estimate=cost,
        )(xr, bmat)
        return out.reshape(N, D)

    # General path: row-wise reduction over the feature axis.  For D a
    # multiple of 128 the stores are already lane-dense; otherwise the tail
    # lanes are masked (accepted for non-conforming shapes).
    tr = _pick_tile_rows(N, D * itemsize, itemsize, tile_rows)
    tile_bytes = tr * D * itemsize
    cost = pl.CostEstimate(
        flops=int(3 * N * D),
        transcendentals=int(N),
        bytes_accessed=int(2 * N * D * itemsize))
    return pl.pallas_call(
        _make_rowwise_kernel(power),
        out_shape=jax.ShapeDtypeStruct((N, D), x.dtype),
        grid=(pl.cdiv(N, tr),),
        in_specs=[pl.BlockSpec((tr, D), lambda i: (i, 0))],
        out_specs=pl.BlockSpec((tr, D), lambda i: (i, 0)),
        compiler_params=pltpu.CompilerParams(
            dimension_semantics=("parallel",),
            vmem_limit_bytes=_vmem_limit_bytes(tile_bytes)),
        cost_estimate=cost,
    )(x)


def _ref_normalize(x, power=2):
    """Pure-JAX reference matching the PyTorch forward exactly."""
    norm = jnp.power(jnp.sum(jnp.power(x, power), axis=1, keepdims=True),
                     1.0 / power)
    return x / norm


if __name__ == "__main__":
    key = jax.random.PRNGKey(0)
    k1, k2, k3, k4 = jax.random.split(key, 4)

    # 1) Module-typical projection-head shape: batch=2, hidden=32 (general path).
    x1 = jax.random.normal(k1, (2, 32), dtype=jnp.float32)
    o1 = jax.block_until_ready(normalize(x1, power=2))
    assert o1.shape == x1.shape and o1.dtype == x1.dtype
    assert jnp.allclose(o1, _ref_normalize(x1, 2), atol=1e-5, rtol=1e-5)

    # 2) Multi-step general path (D = 128, forced small tile -> 4 grid steps).
    x2 = jax.random.normal(k2, (64, 128), dtype=jnp.float32)
    o2 = jax.block_until_ready(normalize(x2, power=2, tile_rows=16))
    assert jnp.allclose(o2, _ref_normalize(x2, 2), atol=1e-5, rtol=1e-5)

    # 3) Lane-dense repack path: (64, 32) -> (16, 128), MXU segmented reduce.
    x3 = jax.random.normal(k3, (64, 32), dtype=jnp.float32)
    o3 = jax.block_until_ready(normalize(x3, power=2))
    assert jnp.allclose(o3, _ref_normalize(x3, 2), atol=1e-5, rtol=1e-5)

    # 4) Generic (non-default) power through the lane-dense path.
    x4 = jax.random.normal(k4, (32, 32), dtype=jnp.float32)
    o4 = jax.block_until_ready(normalize(x4, power=4))
    assert jnp.allclose(o4, _ref_normalize(x4, 4), atol=1e-5, rtol=1e-5)

    print("KERNEL_OK")
</pallas_src>

<mosaic_0001>
module attributes {stable_mosaic.version = 11 : i64} {
  func.func @kernel(%arg0: i32, %arg1: memref<2x32xf32, #tpu.memory_space<vmem>>, %arg2: memref<2x32xf32, #tpu.memory_space<vmem>>) attributes {dimension_semantics = [#tpu.dimension_semantics<parallel>], iteration_bounds = array<i64: 1>, scalar_prefetch = 0 : i64, scratch_operands = 0 : i64, tpu.core_type = #tpu.core_type<tc>, window_params = [{transform_indices = @transform_0, window_bounds = array<i64: 2, 32>}, {transform_indices = @transform_1, window_bounds = array<i64: 2, 32>}]} {
    %c0 = arith.constant 0 : index
    %c0_0 = arith.constant 0 : index
    %0 = vector.load %arg1[%c0, %c0_0] : memref<2x32xf32, #tpu.memory_space<vmem>>, vector<2x32xf32>
    %1 = arith.mulf %0, %0 : vector<2x32xf32>
    %cst = arith.constant dense<0.000000e+00> : vector<2xf32>
    %2 = vector.multi_reduction <add>, %1, %cst [1] : vector<2x32xf32> to vector<2xf32>
    %3 = vector.shape_cast %2 : vector<2xf32> to vector<2x1xf32>
    %4 = math.rsqrt %3 : vector<2x1xf32>
    %5 = vector.broadcast %4 : vector<2x1xf32> to vector<2x32xf32>
    %6 = arith.mulf %0, %5 : vector<2x32xf32>
    %c0_1 = arith.constant 0 : index
    %c0_2 = arith.constant 0 : index
    %7 = vector.load %arg2[%c0_1, %c0_2] : memref<2x32xf32, #tpu.memory_space<vmem>>, vector<2x32xf32>
    tpu.vector_store %arg2[%c0_1, %c0_2], %6 {strides = array<i32>} : memref<2x32xf32, #tpu.memory_space<vmem>>, vector<2x32xf32>,
    return
  }
  func.func @transform_0(%arg0: i32) -> (i32, i32) {
    %c0_i32 = arith.constant 0 : i32
    %c0_i32_0 = arith.constant 0 : i32
    return %arg0, %c0_i32 : i32, i32
  }
  func.func @transform_1(%arg0: i32) -> (i32, i32) {
    %c0_i32 = arith.constant 0 : i32
    %c0_i32_0 = arith.constant 0 : i32
    return %arg0, %c0_i32 : i32, i32
  }
}

</mosaic_0001>

<bundles_post_ra>
// kernel: normalize.1
= control target key start
LH: loop header
LB: loop body
LE: loop exit
PB: predicated region body
PF: predicated region fallthrough
CT: control target
= control target key end

     0   :  { %6 = vsyncpa [#allocation3], 0  ;;  %s134_s0 = inlined_call_operand.hbm [shape: f32[2,32], index: 0, kind: input, shape index: {}]   ;;  %s135_s1 = inlined_call_operand.hbm [shape: f32[2,32], index: 1, kind: output, shape index: {}]  }
   0x1   :  { %7 = vsyncpa [#allocation4], 0  ;;  %s13_s8 = sshll.u32 %s134_s0, 4  ;;  %s114_s9 = smov [#allocation2]   ;;  %s14_s8 = int_to_ptr.hbm [resolvable:$true] %s13_s8 }
   0x2   :  { %s15_s10 = sshll.u32 %s114_s9, 4  ;;  %s16_s10 = int_to_ptr.vmem [resolvable:$true] %s15_s10 }
   0x3   :  { %18 = dma.hbm_to_vmem [thread:$0]  %s14_s8, 32, %s16_s10, [#allocation3]  }
   0x4   :  { %110 = dma.done.wait [#allocation3], 32  }
   0x5   :  { %111 = vsyncadd [#allocation3], 4294967264  ;;  %v23_v0 = vld [vmem:[#allocation2] sm:$0x3]  ;;  %vm25_vm0 = vcmask 254976   ;;  %s115_s0 = smov [#allocation5]  }
   0x6   :  { %v24_v1 = vmul.f32 %v23_v0, %v23_v0  ;;  %s46_s11 = sshll.u32 %s115_s0, 4  ;;  %s48_s14 = sshll.u32 %s135_s1, 4  ;;  %s47_s11 = int_to_ptr.vmem [resolvable:$true] %s46_s11  ;;  %s49_s14 = int_to_ptr.hbm [resolvable:$true] %s48_s14 }
   0x8   :  { %v26_v2 = vsel %vm25_vm0, %v24_v1, 0.0 }
   0x9   :  { %27 = vadd.xlane.f32.xlu0 %v26_v2 }
  0x7c   :  { %v28_v3 = vpop.xlane.xlu0 %27 }
  0x7d   :  { %60 = vrsqrt.f32 %v28_v3  ;;  %vm35_vm2 = vweird.f32 %v28_v3 }
  0x83   :  { %v61_v4 = vpop.eup %60 }
  0x84   :  { %v30_v5 = vmul.f32 %v61_v4, %v28_v3  ;;  %vm36_vm1 = vweird.f32 %v61_v4 }
  0x85   :  { %vm37_vm3 = vmor %vm35_vm2, %vm36_vm1 }
  0x86   :  { %v31_v6 = vmul.f32 %v61_v4, %v30_v5 }
  0x88   :  { %v32_v7 = vmul.f32 0.5, %v31_v6 }
  0x8a   :  { %v33_v8 = vsub.f32 1.5, %v32_v7 }
  0x8c   :  { %v34_v9 = vmul.f32 %v61_v4, %v33_v8 }
  0x8e   :  { %v38_v10 = vsel %vm37_vm3, %v61_v4, %v34_v9 }
  0x8f   :  { %v39_v11 = vmul.f32 %v38_v10, %v23_v0 }
  0x91   :  { %40 = vst.msk [vmem:[#allocation5] sm:$0x3] %vm25_vm0, %v39_v11 }
  0x92   :  { %51 = dma.vmem_to_hbm [thread:$0]  %s47_s11, 32, %s49_s14, [#allocation4]  }
  0x93   :  { %112 = dma.done.wait [#allocation4], 32  }
  0x94   :  { %113 = vsyncadd [#allocation4], 4294967264 }
  0x95   :  { %56 = vsyncpa [#allocation3], 1 }
  0x96   :  { %57 = vsyncpa [#allocation4], 1 }

</bundles_post_ra>
